<compile_context>
chip_gen: v6e
topology: v6e:2x2x1
jax: 0.10.0
libtpu: 0.0.40
codegen_flags: <defaults>
</compile_context>

<pallas_src>
import functools

import jax
import jax.numpy as jnp
from jax.experimental import pallas as pl
from jax.experimental.pallas import tpu as pltpu


def _round_up(x, m):
    return (x + m - 1) // m * m


def _pick_tile_q(q_valid, min_tile, max_tile=1024):
    """Lane tile for the flattened-spatial axis: multiple of 128, >= min_tile.

    Prefers the largest tile <= max_tile that divides round_up(q_valid, 128)
    and still leaves >= 2 grid steps (pipeline depth / 2nd TensorCore on v7x).
    """
    max_tile = max(max_tile, min_tile)
    q128 = _round_up(q_valid, 128)
    cands = [t for t in range(min_tile, min(q128, max_tile) + 1, 128)
             if q128 % t == 0 and q128 // t >= 2]
    if cands:
        return max(cands), q128
    tile = min(max(q128, min_tile), max_tile)
    return tile, _round_up(q_valid, tile)


def _lblock_kernel(x_ref, w2_ref, wsc_ref, w3_ref, o_ref, *,
                   tap_offsets, center_offset, tile_q):
    """One (batch, spatial-tile) grid step.

    x_ref   : (nq+1, Cin, tile_q) bf16  zero-padded flat input, chunked along q
    w2_ref  : (9, Cout, Cin)      bf16  3x3 taps, t = kh*3 + kw
    wsc_ref : (Cout, Cin)         bf16  [I_Cin ; W1] (fused shortcut weight)
    w3_ref  : (Cout, Cout)        bf16
    o_ref   : (Cout, tile_q)      f32   lane-dense output tile
    """
    cout = o_ref.shape[0]
    qb = pl.program_id(1)

    # Current chunk + next chunk give tile_q + halo flat pixels; every 3x3 tap
    # below is then a *static* lane slice of this VMEM-resident window
    # (no HBM im2col, no unaligned dynamic slicing).
    win = jnp.concatenate([x_ref[qb], x_ref[qb + 1]], axis=-1)   # (Cin, 2*tile_q)

    # conv2: 3x3 dilated conv == 9 shifted 1x1 convs, accumulated in f32.
    acc = jnp.zeros((cout, tile_q), jnp.float32)
    for t, off in enumerate(tap_offsets):
        acc += jnp.dot(w2_ref[t], win[:, off:off + tile_q],
                       preferred_element_type=jnp.float32)
    act = jnp.maximum(acc, 0.0).astype(w3_ref.dtype)             # relu -> bf16

    # shortcut = cat([x, conv1(x)], channel) == W_sc @ x ; the center tap of
    # the padded window is exactly the un-padded input pixel.
    x_c = win[:, center_offset:center_offset + tile_q]
    shortcut = jnp.dot(wsc_ref[...], x_c, preferred_element_type=jnp.float32)

    # conv3 (1x1) + residual add + final relu (f32 epilogue, dense stores).
    # TODO(synk): for tiny channel counts a VPU broadcast-FMA path would avoid
    #             mostly zero-padded MXU passes; jnp.dot kept for generality.
    out3 = jnp.dot(w3_ref[...], act, preferred_element_type=jnp.float32)
    o_ref[...] = jnp.maximum(out3 + shortcut, 0.0).astype(o_ref.dtype)


def lblock_pallas(x_nchw, w1_oihw, w2_oihw, w3_oihw, *, dilation=1,
                  tile_q=None, compute_dtype=jnp.bfloat16):
    """LBlock forward.  x: (N, Cin, H, W) NCHW; weights in PyTorch OIHW layout."""
    N, Cin, H, W = x_nchw.shape
    Cout = int(w3_oihw.shape[0])
    assert Cout > Cin, "LBlock requires out_channels > in_channels"
    assert w1_oihw.shape == (Cout - Cin, Cin, 1, 1)
    assert w2_oihw.shape == (Cout, Cin, 3, 3), "only num_groups=1 is supported"
    assert w3_oihw.shape == (Cout, Cout, 1, 1)
    d = int(dilation)
    Hp, Wp = H + 2 * d, W + 2 * d

    # Flattened padded spatial grid: output position q = h*Wp + w for
    # h in [0, H), w in [0, Wp); columns w >= W are junk (they wrap into the
    # next padded row) and are sliced away at the end.
    q_valid = H * Wp
    min_tile = _round_up(2 * d * Wp + 2 * d, 128)       # >= max 3x3 tap shift
    if tile_q is None:
        tile_q, q_pad = _pick_tile_q(q_valid, min_tile)
    else:
        tile_q = max(_round_up(int(tile_q), 128), min_tile)
        q_pad = _round_up(q_valid, tile_q)
    nq = q_pad // tile_q
    L = q_pad + tile_q                                   # one extra halo chunk

    # --- boundary glue (~1x input bytes, no 9x im2col): pad, flatten, chunk ---
    xb = x_nchw.astype(compute_dtype)
    xp = jnp.pad(xb, ((0, 0), (0, 0), (d, d), (d, d)))             # (N,Cin,Hp,Wp)
    xf = jnp.pad(xp.reshape(N, Cin, Hp * Wp),
                 ((0, 0), (0, 0), (0, L - Hp * Wp)))               # (N,Cin,L)
    x4 = jnp.transpose(xf.reshape(N, Cin, nq + 1, tile_q),
                       (0, 2, 1, 3))                               # (N,nq+1,Cin,T)

    w1m = w1_oihw[:, :, 0, 0].astype(compute_dtype)                # (Cout-Cin,Cin)
    wsc = jnp.concatenate([jnp.eye(Cin, dtype=compute_dtype), w1m], axis=0)
    w2s = jnp.transpose(w2_oihw, (2, 3, 0, 1)).reshape(9, Cout, Cin)
    w2s = w2s.astype(compute_dtype)                                # (9,Cout,Cin)
    w3m = w3_oihw[:, :, 0, 0].astype(compute_dtype)                # (Cout,Cout)

    tap_offsets = tuple(kh * d * Wp + kw * d
                        for kh in range(3) for kw in range(3))
    kernel = functools.partial(
        _lblock_kernel, tap_offsets=tap_offsets,
        center_offset=d * Wp + d, tile_q=tile_q)

    out_ext = pl.pallas_call(
        kernel,
        out_shape=jax.ShapeDtypeStruct((N, Cout, q_pad), x_nchw.dtype),
        grid=(N, nq),
        in_specs=[
            # Full (chunked) flat input of one batch element; constant along
            # the q axis, so it stays VMEM-resident across the inner grid loop.
            pl.BlockSpec((None, nq + 1, Cin, tile_q), lambda n, q: (n, 0, 0, 0)),
            pl.BlockSpec((9, Cout, Cin), lambda n, q: (0, 0, 0)),
            pl.BlockSpec((Cout, Cin), lambda n, q: (0, 0)),
            pl.BlockSpec((Cout, Cout), lambda n, q: (0, 0)),
        ],
        out_specs=pl.BlockSpec((None, Cout, tile_q), lambda n, q: (n, 0, q)),
        compiler_params=pltpu.CompilerParams(
            dimension_semantics=("parallel", "parallel"),
            vmem_limit_bytes=32 * 1024 * 1024,   # tiles sized to fit v7x VMEM
        ),
    )(x4, w2s, wsc, w3m)

    # Drop junk columns / padding, back to NCHW.
    return out_ext[:, :, :q_valid].reshape(N, Cout, H, Wp)[:, :, :, :W]


def lblock_reference(x_nchw, w1, w2, w3, *, dilation=1, act_round_dtype=None):
    """Module semantics via lax.conv_general_dilated (cross-correlation, NCHW)."""
    dn = ("NCHW", "OIHW", "NCHW")
    d = dilation
    out1 = jax.lax.conv_general_dilated(x_nchw, w1, (1, 1), "VALID",
                                        dimension_numbers=dn)
    shortcut = jnp.concatenate([x_nchw, out1], axis=1)
    out2 = jax.lax.conv_general_dilated(x_nchw, w2, (1, 1), [(d, d), (d, d)],
                                        rhs_dilation=(d, d),
                                        dimension_numbers=dn)
    out2 = jnp.maximum(out2, 0.0)
    if act_round_dtype is not None:   # mirror the kernel's bf16 activation
        out2 = out2.astype(act_round_dtype).astype(x_nchw.dtype)
    out3 = jax.lax.conv_general_dilated(out2, w3, (1, 1), "VALID",
                                        dimension_numbers=dn)
    return jnp.maximum(out3 + shortcut, 0.0)


def msra_fill(key, shape):
    """c2_msra_fill: kaiming_normal(fan_out, relu) -> std = sqrt(2 / fan_out)."""
    out_ch, _, kh, kw = shape
    std = (2.0 / (out_ch * kh * kw)) ** 0.5
    return std * jax.random.normal(key, shape, dtype=jnp.float32)


if __name__ == "__main__":
    # Small shapes consistent with the module: N=2, C_in=4, C_out=8, 16x16.
    N, Cin, Cout, H, W = 2, 4, 8, 16, 16
    dilation = 1

    key = jax.random.PRNGKey(0)
    kx, k1, k2, k3 = jax.random.split(key, 4)
    x = jax.random.normal(kx, (N, Cin, H, W), dtype=jnp.float32)   # NCHW
    w1 = msra_fill(k1, (Cout - Cin, Cin, 1, 1))                    # conv1
    w2 = msra_fill(k2, (Cout, Cin, 3, 3))                          # conv2
    w3 = msra_fill(k3, (Cout, Cout, 1, 1))                         # conv3

    y = lblock_pallas(x, w1, w2, w3, dilation=dilation)
    y = jax.block_until_ready(y)
    assert y.shape == (N, Cout, H, W)

    # 1) Exactness of the kernel against the same bf16-operand / f32-accumulate
    #    recipe in plain JAX (only accumulation order differs).
    bf = lambda a: a.astype(jnp.bfloat16).astype(jnp.float32)
    y_rec = lblock_reference(bf(x), bf(w1), bf(w2), bf(w3), dilation=dilation,
                             act_round_dtype=jnp.bfloat16)
    assert jnp.allclose(y, y_rec, rtol=2e-3, atol=2e-3), \
        float(jnp.max(jnp.abs(y - y_rec)))

    # 2) Semantic fidelity vs. the full-f32 module math (the gap is purely the
    #    bf16 operand / activation rounding quantified by check 1).
    y_f32 = lblock_reference(x, w1, w2, w3, dilation=dilation)
    assert jnp.allclose(y, y_f32, rtol=1e-1, atol=1e-1), \
        float(jnp.max(jnp.abs(y - y_f32)))

    print("KERNEL_OK")
</pallas_src>

<mosaic_0001>
module attributes {stable_mosaic.version = 11 : i64} {
  func.func @_lblock_kernel(%arg0: i32, %arg1: i32, %arg2: memref<1x4x4x128xbf16, #tpu.memory_space<vmem>>, %arg3: memref<9x8x4xbf16, #tpu.memory_space<vmem>>, %arg4: memref<8x4xbf16, #tpu.memory_space<vmem>>, %arg5: memref<8x8xbf16, #tpu.memory_space<vmem>>, %arg6: memref<1x8x128xf32, #tpu.memory_space<vmem>>) attributes {dimension_semantics = [#tpu.dimension_semantics<parallel>, #tpu.dimension_semantics<parallel>], iteration_bounds = array<i64: 2, 3>, scalar_prefetch = 0 : i64, scratch_operands = 0 : i64, tpu.core_type = #tpu.core_type<tc>, window_params = [{transform_indices = @transform_0, window_bounds = array<i64: 1, 4, 4, 128>}, {pipeline_mode = #tpu.pipeline_mode<synchronous>, transform_indices = @transform_1, window_bounds = array<i64: 9, 8, 4>}, {pipeline_mode = #tpu.pipeline_mode<synchronous>, transform_indices = @transform_2, window_bounds = array<i64: 8, 4>}, {pipeline_mode = #tpu.pipeline_mode<synchronous>, transform_indices = @transform_3, window_bounds = array<i64: 8, 8>}, {transform_indices = @transform_4, window_bounds = array<i64: 1, 8, 128>}]} {
    %c0 = arith.constant 0 : index
    %0 = arith.index_cast %arg1 : i32 to index
    %c0_0 = arith.constant 0 : index
    %c0_1 = arith.constant 0 : index
    %1 = vector.load %arg2[%c0, %0, %c0_0, %c0_1] : memref<1x4x4x128xbf16, #tpu.memory_space<vmem>>, vector<1x1x4x128xbf16>
    %2 = vector.shape_cast %1 : vector<1x1x4x128xbf16> to vector<4x128xbf16>
    %c1_i32 = arith.constant 1 : i32
    %3 = arith.addi %arg1, %c1_i32 : i32
    %c0_2 = arith.constant 0 : index
    %4 = arith.index_cast %3 : i32 to index
    %c0_3 = arith.constant 0 : index
    %c0_4 = arith.constant 0 : index
    %5 = vector.load %arg2[%c0_2, %4, %c0_3, %c0_4] : memref<1x4x4x128xbf16, #tpu.memory_space<vmem>>, vector<1x1x4x128xbf16>
    %6 = vector.shape_cast %5 : vector<1x1x4x128xbf16> to vector<4x128xbf16>
    %7 = tpu.concatenate %2, %6 in 1 : vector<4x128xbf16>, vector<4x128xbf16> -> vector<4x256xbf16>
    %cst = arith.constant 0.000000e+00 : f32
    %8 = vector.broadcast %cst : f32 to vector<8x128xf32>
    %c0_5 = arith.constant 0 : index
    %c0_6 = arith.constant 0 : index
    %c0_7 = arith.constant 0 : index
    %9 = vector.load %arg3[%c0_5, %c0_6, %c0_7] : memref<9x8x4xbf16, #tpu.memory_space<vmem>>, vector<1x8x4xbf16>
    %10 = vector.shape_cast %9 : vector<1x8x4xbf16> to vector<8x4xbf16>
    %11 = vector.extract_strided_slice %7 {offsets = [0, 0], sizes = [4, 128], strides = [1, 1]} : vector<4x256xbf16> to vector<4x128xbf16>
    %cst_8 = arith.constant dense<0.000000e+00> : vector<8x128xf32>
    %12 = tpu.matmul %10, %11, %cst_8 {dimension_numbers = #tpu.dot_dimension_numbers<[1], [0], [0], [1], [0, 0, 1, 1], [], []>} : vector<8x4xbf16>, vector<4x128xbf16>, vector<8x128xf32> -> vector<8x128xf32>
    %13 = arith.addf %8, %12 : vector<8x128xf32>
    %c1 = arith.constant 1 : index
    %c0_9 = arith.constant 0 : index
    %c0_10 = arith.constant 0 : index
    %14 = vector.load %arg3[%c1, %c0_9, %c0_10] : memref<9x8x4xbf16, #tpu.memory_space<vmem>>, vector<1x8x4xbf16>
    %15 = vector.shape_cast %14 : vector<1x8x4xbf16> to vector<8x4xbf16>
    %16 = vector.extract_strided_slice %7 {offsets = [0, 1], sizes = [4, 128], strides = [1, 1]} : vector<4x256xbf16> to vector<4x128xbf16>
    %cst_11 = arith.constant dense<0.000000e+00> : vector<8x128xf32>
    %17 = tpu.matmul %15, %16, %cst_11 {dimension_numbers = #tpu.dot_dimension_numbers<[1], [0], [0], [1], [0, 0, 1, 1], [], []>} : vector<8x4xbf16>, vector<4x128xbf16>, vector<8x128xf32> -> vector<8x128xf32>
    %18 = arith.addf %13, %17 : vector<8x128xf32>
    %c2 = arith.constant 2 : index
    %c0_12 = arith.constant 0 : index
    %c0_13 = arith.constant 0 : index
    %19 = vector.load %arg3[%c2, %c0_12, %c0_13] : memref<9x8x4xbf16, #tpu.memory_space<vmem>>, vector<1x8x4xbf16>
    %20 = vector.shape_cast %19 : vector<1x8x4xbf16> to vector<8x4xbf16>
    %21 = vector.extract_strided_slice %7 {offsets = [0, 2], sizes = [4, 128], strides = [1, 1]} : vector<4x256xbf16> to vector<4x128xbf16>
    %cst_14 = arith.constant dense<0.000000e+00> : vector<8x128xf32>
    %22 = tpu.matmul %20, %21, %cst_14 {dimension_numbers = #tpu.dot_dimension_numbers<[1], [0], [0], [1], [0, 0, 1, 1], [], []>} : vector<8x4xbf16>, vector<4x128xbf16>, vector<8x128xf32> -> vector<8x128xf32>
    %23 = arith.addf %18, %22 : vector<8x128xf32>
    %c3 = arith.constant 3 : index
    %c0_15 = arith.constant 0 : index
    %c0_16 = arith.constant 0 : index
    %24 = vector.load %arg3[%c3, %c0_15, %c0_16] : memref<9x8x4xbf16, #tpu.memory_space<vmem>>, vector<1x8x4xbf16>
    %25 = vector.shape_cast %24 : vector<1x8x4xbf16> to vector<8x4xbf16>
    %26 = vector.extract_strided_slice %7 {offsets = [0, 18], sizes = [4, 128], strides = [1, 1]} : vector<4x256xbf16> to vector<4x128xbf16>
    %cst_17 = arith.constant dense<0.000000e+00> : vector<8x128xf32>
    %27 = tpu.matmul %25, %26, %cst_17 {dimension_numbers = #tpu.dot_dimension_numbers<[1], [0], [0], [1], [0, 0, 1, 1], [], []>} : vector<8x4xbf16>, vector<4x128xbf16>, vector<8x128xf32> -> vector<8x128xf32>
    %28 = arith.addf %23, %27 : vector<8x128xf32>
    %c4 = arith.constant 4 : index
    %c0_18 = arith.constant 0 : index
    %c0_19 = arith.constant 0 : index
    %29 = vector.load %arg3[%c4, %c0_18, %c0_19] : memref<9x8x4xbf16, #tpu.memory_space<vmem>>, vector<1x8x4xbf16>
    %30 = vector.shape_cast %29 : vector<1x8x4xbf16> to vector<8x4xbf16>
    %31 = vector.extract_strided_slice %7 {offsets = [0, 19], sizes = [4, 128], strides = [1, 1]} : vector<4x256xbf16> to vector<4x128xbf16>
    %cst_20 = arith.constant dense<0.000000e+00> : vector<8x128xf32>
    %32 = tpu.matmul %30, %31, %cst_20 {dimension_numbers = #tpu.dot_dimension_numbers<[1], [0], [0], [1], [0, 0, 1, 1], [], []>} : vector<8x4xbf16>, vector<4x128xbf16>, vector<8x128xf32> -> vector<8x128xf32>
    %33 = arith.addf %28, %32 : vector<8x128xf32>
    %c5 = arith.constant 5 : index
    %c0_21 = arith.constant 0 : index
    %c0_22 = arith.constant 0 : index
    %34 = vector.load %arg3[%c5, %c0_21, %c0_22] : memref<9x8x4xbf16, #tpu.memory_space<vmem>>, vector<1x8x4xbf16>
    %35 = vector.shape_cast %34 : vector<1x8x4xbf16> to vector<8x4xbf16>
    %36 = vector.extract_strided_slice %7 {offsets = [0, 20], sizes = [4, 128], strides = [1, 1]} : vector<4x256xbf16> to vector<4x128xbf16>
    %cst_23 = arith.constant dense<0.000000e+00> : vector<8x128xf32>
    %37 = tpu.matmul %35, %36, %cst_23 {dimension_numbers = #tpu.dot_dimension_numbers<[1], [0], [0], [1], [0, 0, 1, 1], [], []>} : vector<8x4xbf16>, vector<4x128xbf16>, vector<8x128xf32> -> vector<8x128xf32>
    %38 = arith.addf %33, %37 : vector<8x128xf32>
    %c6 = arith.constant 6 : index
    %c0_24 = arith.constant 0 : index
    %c0_25 = arith.constant 0 : index
    %39 = vector.load %arg3[%c6, %c0_24, %c0_25] : memref<9x8x4xbf16, #tpu.memory_space<vmem>>, vector<1x8x4xbf16>
    %40 = vector.shape_cast %39 : vector<1x8x4xbf16> to vector<8x4xbf16>
    %41 = vector.extract_strided_slice %7 {offsets = [0, 36], sizes = [4, 128], strides = [1, 1]} : vector<4x256xbf16> to vector<4x128xbf16>
    %cst_26 = arith.constant dense<0.000000e+00> : vector<8x128xf32>
    %42 = tpu.matmul %40, %41, %cst_26 {dimension_numbers = #tpu.dot_dimension_numbers<[1], [0], [0], [1], [0, 0, 1, 1], [], []>} : vector<8x4xbf16>, vector<4x128xbf16>, vector<8x128xf32> -> vector<8x128xf32>
    %43 = arith.addf %38, %42 : vector<8x128xf32>
    %c7 = arith.constant 7 : index
    %c0_27 = arith.constant 0 : index
    %c0_28 = arith.constant 0 : index
    %44 = vector.load %arg3[%c7, %c0_27, %c0_28] : memref<9x8x4xbf16, #tpu.memory_space<vmem>>, vector<1x8x4xbf16>
    %45 = vector.shape_cast %44 : vector<1x8x4xbf16> to vector<8x4xbf16>
    %46 = vector.extract_strided_slice %7 {offsets = [0, 37], sizes = [4, 128], strides = [1, 1]} : vector<4x256xbf16> to vector<4x128xbf16>
    %cst_29 = arith.constant dense<0.000000e+00> : vector<8x128xf32>
    %47 = tpu.matmul %45, %46, %cst_29 {dimension_numbers = #tpu.dot_dimension_numbers<[1], [0], [0], [1], [0, 0, 1, 1], [], []>} : vector<8x4xbf16>, vector<4x128xbf16>, vector<8x128xf32> -> vector<8x128xf32>
    %48 = arith.addf %43, %47 : vector<8x128xf32>
    %c8 = arith.constant 8 : index
    %c0_30 = arith.constant 0 : index
    %c0_31 = arith.constant 0 : index
    %49 = vector.load %arg3[%c8, %c0_30, %c0_31] : memref<9x8x4xbf16, #tpu.memory_space<vmem>>, vector<1x8x4xbf16>
    %50 = vector.shape_cast %49 : vector<1x8x4xbf16> to vector<8x4xbf16>
    %51 = vector.extract_strided_slice %7 {offsets = [0, 38], sizes = [4, 128], strides = [1, 1]} : vector<4x256xbf16> to vector<4x128xbf16>
    %cst_32 = arith.constant dense<0.000000e+00> : vector<8x128xf32>
    %52 = tpu.matmul %50, %51, %cst_32 {dimension_numbers = #tpu.dot_dimension_numbers<[1], [0], [0], [1], [0, 0, 1, 1], [], []>} : vector<8x4xbf16>, vector<4x128xbf16>, vector<8x128xf32> -> vector<8x128xf32>
    %53 = arith.addf %48, %52 : vector<8x128xf32>
    %cst_33 = arith.constant 0.000000e+00 : f32
    %54 = vector.broadcast %cst_33 : f32 to vector<8x128xf32>
    %55 = arith.maximumf %53, %54 : vector<8x128xf32>
    %56 = arith.truncf %55 : vector<8x128xf32> to vector<8x128xbf16>
    %57 = vector.extract_strided_slice %7 {offsets = [0, 19], sizes = [4, 128], strides = [1, 1]} : vector<4x256xbf16> to vector<4x128xbf16>
    %c0_34 = arith.constant 0 : index
    %c0_35 = arith.constant 0 : index
    %58 = vector.load %arg4[%c0_34, %c0_35] : memref<8x4xbf16, #tpu.memory_space<vmem>>, vector<8x4xbf16>
    %cst_36 = arith.constant dense<0.000000e+00> : vector<8x128xf32>
    %59 = tpu.matmul %58, %57, %cst_36 {dimension_numbers = #tpu.dot_dimension_numbers<[1], [0], [0], [1], [0, 0, 1, 1], [], []>} : vector<8x4xbf16>, vector<4x128xbf16>, vector<8x128xf32> -> vector<8x128xf32>
    %c0_37 = arith.constant 0 : index
    %c0_38 = arith.constant 0 : index
    %60 = vector.load %arg5[%c0_37, %c0_38] : memref<8x8xbf16, #tpu.memory_space<vmem>>, vector<8x8xbf16>
    %cst_39 = arith.constant dense<0.000000e+00> : vector<8x128xf32>
    %61 = tpu.matmul %60, %56, %cst_39 {dimension_numbers = #tpu.dot_dimension_numbers<[1], [0], [0], [1], [0, 0, 1, 1], [], []>} : vector<8x8xbf16>, vector<8x128xbf16>, vector<8x128xf32> -> vector<8x128xf32>
    %62 = arith.addf %61, %59 : vector<8x128xf32>
    %cst_40 = arith.constant 0.000000e+00 : f32
    %63 = vector.broadcast %cst_40 : f32 to vector<8x128xf32>
    %64 = arith.maximumf %62, %63 : vector<8x128xf32>
    %c0_41 = arith.constant 0 : index
    %c0_42 = arith.constant 0 : index
    %c0_43 = arith.constant 0 : index
    %65 = vector.load %arg6[%c0_41, %c0_42, %c0_43] : memref<1x8x128xf32, #tpu.memory_space<vmem>>, vector<1x8x128xf32>
    %66 = vector.shape_cast %65 : vector<1x8x128xf32> to vector<8x128xf32>
    %67 = vector.shape_cast %64 : vector<8x128xf32> to vector<1x8x128xf32>
    tpu.vector_store %arg6[%c0_41, %c0_42, %c0_43], %67 {strides = array<i32>} : memref<1x8x128xf32, #tpu.memory_space<vmem>>, vector<1x8x128xf32>,
    return
  }
  func.func @transform_0(%arg0: i32, %arg1: i32) -> (i32, i32, i32, i32) {
    %c0_i32 = arith.constant 0 : i32
    %c0_i32_0 = arith.constant 0 : i32
    %c0_i32_1 = arith.constant 0 : i32
    %c0_i32_2 = arith.constant 0 : i32
    return %arg0, %c0_i32, %c0_i32_0, %c0_i32_1 : i32, i32, i32, i32
  }
  func.func @transform_1(%arg0: i32, %arg1: i32) -> (i32, i32, i32) {
    %c0_i32 = arith.constant 0 : i32
    %c0_i32_0 = arith.constant 0 : i32
    %c0_i32_1 = arith.constant 0 : i32
    %c0_i32_2 = arith.constant 0 : i32
    return %c0_i32, %c0_i32_0, %c0_i32_1 : i32, i32, i32
  }
  func.func @transform_2(%arg0: i32, %arg1: i32) -> (i32, i32) {
    %c0_i32 = arith.constant 0 : i32
    %c0_i32_0 = arith.constant 0 : i32
    %c0_i32_1 = arith.constant 0 : i32
    return %c0_i32, %c0_i32_0 : i32, i32
  }
  func.func @transform_3(%arg0: i32, %arg1: i32) -> (i32, i32) {
    %c0_i32 = arith.constant 0 : i32
    %c0_i32_0 = arith.constant 0 : i32
    %c0_i32_1 = arith.constant 0 : i32
    return %c0_i32, %c0_i32_0 : i32, i32
  }
  func.func @transform_4(%arg0: i32, %arg1: i32) -> (i32, i32, i32) {
    %c0_i32 = arith.constant 0 : i32
    %c0_i32_0 = arith.constant 0 : i32
    return %arg0, %c0_i32, %arg1 : i32, i32, i32
  }
}

</mosaic_0001>

<bundles_post_ra>
// kernel: tpu_custom_call.1
= control target key start
LH: loop header
LB: loop body
LE: loop exit
PB: predicated region body
PF: predicated region fallthrough
CT: control target
= control target key end

     0   :  { %9 = vsyncpa [#allocation3], 0  ;;  %s1453_s0 = inlined_call_operand.vmem [shape: bf16[2,4,4,128], index: 0, kind: input, shape index: {}]   ;;  %s1454_s1 = inlined_call_operand.vmem [shape: bf16[9,8,4], index: 1, kind: input, shape index: {}]   ;;  %s1455_s2 = inlined_call_operand.vmem [shape: bf16[8,4], index: 2, kind: input, shape index: {}]   ;;  %s1456_s3 = inlined_call_operand.vmem [shape: bf16[8,8], index: 3, kind: input, shape index: {}]   ;;  %s1457_s4 = inlined_call_operand.hbm [shape: f32[2,8,384], index: 4, kind: output, shape index: {}]  }
   0x1   :  { %11 = vsyncpa [#allocation3 + $0x1], 0  ;;  %s1233_s15 = smov 0   ;;  %s1235_s16 = smov 0  }
   0x2   :  { %s1237_s17 = smov 0   ;;  %s1239_s18 = smov 0  }
   0x3   :  { %s1241_s19 = smov 0   ;;  %s1243_s20 = smov 0  }
   0x4   :  { %s1245_s21 = smov 0   ;;  %s1247_s22 = smov 0  }
   0x5 LB: > { %s898_s23 = sadd.s32 4294967295, %s1195_s22   ;;  %s899_s24 = sadd.s32 4294967294, %s1195_s22   ;;  %s1195_s22 = sphi %s1247_s22, %s17_s22   ;;  %s1191_s21 = sphi %s1245_s21, %s1466_s21   ;;  %s1187_s20 = sphi %s1243_s20, %s1465_s20   ;;  %s1183_s19 = sphi %s1241_s19, %s1464_s19   ;;  %s1179_s18 = sphi %s1239_s18, %s1463_s18   ;;  %s1175_s17 = sphi %s1237_s17, %s1462_s17   ;;  %s1171_s16 = sphi %s1235_s16, %s1461_s16   ;;  %s1167_s15 = sphi %s1233_s15, %s1460_s15  }
   0x6   : > { %s26_s25 = sadd.s32 1, %s1187_s20  ;;  %s29_s26 = sadd.s32 1, %s1191_s21 }
   0x7   : > { %p27_p0 = scmp.ge.s32.totalorder %s26_s25, 3  ;;  %p137_p1 = scmp.ne.s32.totalorder %s1175_s17, %s1171_s16 }
   0x8   : > { %p138_p2 = scmp.eq.s32.totalorder %s898_s23, 5  ;;  %p143_p5 = scmp.ne.s32.totalorder %s1171_s16, %s1167_s15 }
   0x9   : > { %s1468_s25 = smov (%p27_p0, %s26_s25), 0  ;;  %s1470_s26 = smov (!%p27_p0, %s29_s26), %s1191_s21 }
   0xa   : > { %s123_s27 = ssub.s32 %s1187_s20, %s1468_s25  ;;  %p1284_p3 = por %p138_p2, %p137_p1 }
   0xb   : > { %p31_p4 = scmp.ge.s32.totalorder %s1470_s26, 2  ;;  %p144_p6 = scmp.eq.s32.totalorder %s899_s24, 5 }
   0xc   : > { %p902_p7 = scmp.ge.s32.totalorder %s1195_s22, 1  ;;  %p179_p9 = scmp.lt.s32.totalorder %s1195_s22, 7 }
   0xd   : > { %s1472_s26 = smov (%p31_p4, %s1470_s26), 0  ;;  %p1293_p8 = por %p144_p6, %p143_p5 }
   0xe   : > { %s122_s30 = ssub.s32 %s1191_s21, %s1472_s26  ;;  %s127_s5 = sadd.s32 1, %s1175_s17 }
   0xf   : > { %s124_s6 = sor.u32 %s123_s27, %s122_s30  ;;  %p180_p10 = pnand %p902_p7, %p179_p9 }
  0x10   : > { %p125_p11 = scmp.eq.s32.totalorder %s124_s6, 0  ;;  %p205_p12 = scmp.lt.s32.totalorder (!%p180_p10), %s1183_s19, 1 }
  0x11   : > { %183 = sbr.rel (%p180_p10) target bundleno = 598 (0x256), region = 36  ;;  %s906_s9 = sshll.u32 (!%p180_p10), %s1179_s18, 1 }
  0x12   : > { %s1302_s7 = scalar_select %p125_p11, %s1175_s17, %s127_s5  }
  0x13   : > { %s1199_s23 = smov (!%p180_p10), 126   ;;  %s1200_s24 = smov (!%p180_p10), 127  }
  0x14   : > { %s1201_s5 = smov (!%p180_p10), 110   ;;  %s1202_s6 = smov (!%p180_p10), 109  }
  0x15   : > { %s1206_s11 = smov (!%p180_p10), 90  }
  0x16   : > { %v1197_v0 = vmov 0.0   ;;  %s206_s8 = scalar_select %p205_p12, %s1183_s19, 1  ;;  %vm1198_vm0 = vmmov 0   ;;  %vm233_vm1 = vcmask 1041408   ;;  %v218_v4 = vld [vmem:[%s1454_s1] sm:$0xf] }
  0x17   : > { %961 = vmatprep.subr.bf16.mxu1 %v1197_v0  ;;  %955 = vmatprep.subr.bf16.mxu0 %v1197_v0  ;;  %vm229_vm2 = vcmask 31744   ;;  %vm329_vm3 = vcmask 1031168   ;;  %vm227_vm4 = vcmask 1039360   ;;  %vm384_vm5 = vcmask 900096   ;;  %v909_v12 = vld [vmem:[%s1454_s1 + $0x4] sm:$0xf] }
  0x18   : > { %963 = vmatprep.mubr.msk.bf16.mxu1 %vm1198_vm0, %v1197_v0  ;;  %957 = vmatprep.mubr.msk.bf16.mxu0 %vm1198_vm0, %v1197_v0  ;;  %s932_s10 = sshll.u32 %s206_s8, 3  ;;  %s1203_s8 = smov 108   ;;  %vm439_vm6 = vcmask 891904   ;;  %v914_v18 = vld [vmem:[%s1454_s1 + $0xc] sm:$0xf]  ;;  %vm494_vm7 = vcmask 883712  }
  0x19   : > { %s209_s13 = scalar_lea.vmem %s1453_s0, %s932_s10  ;;  %s1205_s10 = smov 91   ;;  %v912_v22 = vld [vmem:[%s1454_s1 + $0x8] sm:$0xf]  ;;  %vm549_vm8 = vcmask 752640   ;;  %v918_v28 = vld [vmem:[%s1454_s1 + $0x14] sm:$0xf] }
  0x1a   : > { %s212_s14 = scalar_lea.vmem %s209_s13, %s906_s9  ;;  %s1204_s9 = smov 92   ;;  %vm604_vm9 = vcmask 744448   ;;  %v916_v32 = vld [vmem:[%s1454_s1 + $0x10] sm:$0xf]  ;;  %vm659_vm10 = vcmask 736256   ;;  %vm759_vm11 = vcmask 1043456  }
  0x1b   : > { %v213_v1 = vld [vmem:[%s212_s14] sm:$0x3]  ;;  %v908_v3 = vld [vmem:[%s212_s14 + $0x2] sm:$0x3]  ;;  %v922_v38 = vld [vmem:[%s1454_s1 + $0x1c] sm:$0xf] }
  0x1c   : > { %325 = vrot.lane.b32.xlu1 %v213_v1, %s1199_s23  ;;  %223 = vrot.lane.b32.xlu0 %v213_v1, %s1200_s24  ;;  %v281_v2 = vsel %vm233_vm1, %v213_v1, 0  ;;  %v920_v42 = vld [vmem:[%s1454_s1 + $0x18] sm:$0xf]  ;;  %v924_v44 = vld [vmem:[%s1454_s1 + $0x20] sm:$0xf]  ;;  %vm755_vm12 = vcmask 64512  }
  0x1d   : > { %962 = vmatpush3.bf16.msra.mxu1 %v281_v2  ;;  %v710_v49 = vld [vmem:[%s1455_s2] sm:$0xf] }
  0x1e   : > { %973 = vmatprep.subr.bf16.mxu1 %v1197_v0 }
  0x20   : > { %327 = vrot.lane.b32.xlu1 %v908_v3, %s1199_s23  ;;  %225 = vrot.lane.b32.xlu0 %v908_v3, %s1200_s24  ;;  %s1207_s24 = smov [#allocation2]  }
  0x21   : > { %964 = vmatmul.mubr.msk.bf16.vlgmr.msra.gmra.mxu1 %vm229_vm2, %v218_v4  ;;  %s1107_s27 = sshll.u32 %s1207_s24, 4  ;;  %s1108_s27 = int_to_ptr.vmem [resolvable:$false] %s1107_s27 }
  0x22   : > { %975 = vmatprep.mubr.msk.bf16.mxu1 %vm1198_vm0, %v1197_v0  ;;  %s1109_s30 = scalar_lea.vmem %s1108_s27, 256 }
  0x24   : > { %382 = vrot.lane.b32.xlu1 %v908_v3, %s1201_s5  ;;  %380 = vrot.lane.b32.xlu0 %v213_v1, %s1201_s5  ;;  %s202_s5 = sand.u32 1, %s1171_s16  }
  0x28   : > { %437 = vrot.lane.b32.xlu1 %v908_v3, %s1202_s6  ;;  %435 = vrot.lane.b32.xlu0 %v213_v1, %s1202_s6  ;;  %s1021_s6 = smul.u32 3, %s1183_s19 }
  0x2c   : > { %492 = vrot.lane.b32.xlu1 %v908_v3, %s1203_s8  ;;  %490 = vrot.lane.b32.xlu0 %v213_v1, %s1203_s8  ;;  %s903_s8 = sshll.u32 %s202_s5, 3 }
  0x30   : > { %547 = vrot.lane.b32.xlu1 %v908_v3, %s1204_s9  ;;  %545 = vrot.lane.b32.xlu0 %v213_v1, %s1204_s9  ;;  %s817_s9 = sadd.s32 %s1179_s18, %s1021_s6  ;;  %s806_s18 = scalar_lea.sflag [#allocation3], %s202_s5 }
  0x34   : > { %602 = vrot.lane.b32.xlu1 %v908_v3, %s1205_s10  ;;  %600 = vrot.lane.b32.xlu0 %v213_v1, %s1205_s10  ;;  %s929_s10 = sshll.u32 %s817_s9, 7 }
  0x35   : > { %s1401_s23 = scalar_lea.hbm %s1457_s4, %s929_s10 }
  0x38   : > { %657 = vrot.lane.b32.xlu1 %v908_v3, %s1206_s11  ;;  %655 = vrot.lane.b32.xlu0 %v213_v1, %s1206_s11  ;;  %s204_s11 = scalar_lea.vmem [#allocation2], %s903_s8 }
  0x39   : > { %s821_s12 = sshll.u32 %s204_s11, 4  ;;  %s1403_s12 = int_to_ptr.vmem [resolvable:$true] %s821_s12 }
  0x3a   : > { %s1103_s19 = scalar_lea.vmem %s1403_s12, 128  ;;  %p1110_p2 = scmp.lt.s32.totalorder %s1403_s12, %s1108_s27 }
  0x3b   : > { %p1104_p13 = scmp.ne.s32.totalorder %s1403_s12, %s1103_s19  ;;  %p1111_p4 = scmp.lt.s32.totalorder %s1109_s30, %s1103_s19 }
  0x3d   : > { %p1105_p0 = pnand %p1104_p13, %p1284_p3  ;;  %p1112_p5 = por %p1111_p4, %p1110_p2 }
  0x3f   : > { %p1106_p1 = pneg %p1105_p0 }
  0x41   : > { %p1113_p6 = pnand %p1112_p5, %p1106_p1 }
  0x8e   : > { %v326_v5 = vpop.permute.xlu1 %325  ;;  %v224_v6 = vpop.permute.xlu0 %223 }
  0x92   : > { %v328_v7 = vpop.permute.xlu1 %327  ;;  %v226_v8 = vpop.permute.xlu0 %225 }
  0x93   : > { %v330_v9 = vsel %vm329_vm3, %v326_v5, %v328_v7  ;;  %v228_v10 = vsel %vm227_vm4, %v224_v6, %v226_v8 }
  0x94   : > { %v235_v11 = vsel %vm233_vm1, %v228_v10, 0  ;;  %v335_v13 = vsel %vm233_vm1, %v330_v9, 0 }
  0x95   : > { %956 = vmatpush3.bf16.msra.mxu0 %v235_v11 }
  0x96   : > { %v383_v14 = vpop.permute.xlu1 %382  ;;  %v381_v15 = vpop.permute.xlu0 %380  ;;  %967 = vmatprep.subr.bf16.mxu0 %v1197_v0 }
  0x97   : > { %v385_v16 = vsel %vm384_vm5, %v381_v15, %v383_v14 }
  0x98   : > { %v390_v17 = vsel %vm233_vm1, %v385_v16, 0  ;;  %958 = vmatmul.mubr.msk.bf16.vlgmr.msra.gmra.mxu0 %vm229_vm2, %v909_v12 }
  0x99   : > { %968 = vmatpush3.bf16.msra.mxu0 %v335_v13  ;;  %974 = vmatpush3.bf16.msra.mxu1 %v390_v17 }
  0x9a   : > { %v438_v19 = vpop.permute.xlu1 %437  ;;  %v436_v20 = vpop.permute.xlu0 %435  ;;  %969 = vmatprep.mubr.msk.bf16.mxu0 %vm1198_vm0, %v1197_v0  ;;  %985 = vmatprep.subr.bf16.mxu1 %v1197_v0 }
  0x9b   : > { %v440_v21 = vsel %vm439_vm6, %v436_v20, %v438_v19  ;;  %979 = vmatprep.subr.bf16.mxu0 %v1197_v0 }
  0x9c   : > { %976 = vmatmul.mubr.msk.bf16.vlgmr.msra.gmra.mxu1 %vm229_vm2, %v914_v18  ;;  %v445_v23 = vsel %vm233_vm1, %v440_v21, 0 }
  0x9d   : > { %987 = vmatprep.mubr.msk.bf16.mxu1 %vm1198_vm0, %v1197_v0 }
  0x9e   : > { %v493_v24 = vpop.permute.xlu1 %492  ;;  %v491_v25 = vpop.permute.xlu0 %490 }
  0x9f   : > { %v495_v26 = vsel %vm494_vm7, %v491_v25, %v493_v24 }
  0xa0   : > { %v500_v27 = vsel %vm233_vm1, %v495_v26, 0  ;;  %970 = vmatmul.mubr.msk.bf16.vlgmr.msra.gmra.mxu0 %vm229_vm2, %v912_v22 }
  0xa1   : > { %986 = vmatpush3.bf16.msra.mxu1 %v500_v27  ;;  %980 = vmatpush3.bf16.msra.mxu0 %v445_v23 }
  0xa2   : > { %v548_v29 = vpop.permute.xlu1 %547  ;;  %v546_v30 = vpop.permute.xlu0 %545  ;;  %981 = vmatprep.mubr.msk.bf16.mxu0 %vm1198_vm0, %v1197_v0  ;;  %997 = vmatprep.subr.bf16.mxu1 %v1197_v0 }
  0xa3   : > { %v550_v31 = vsel %vm549_vm8, %v546_v30, %v548_v29  ;;  %991 = vmatprep.subr.bf16.mxu0 %v1197_v0  ;;  %v754_v29 = vld [vmem:[%s1456_s3] sm:$0xf] }
  0xa4   : > { %988 = vmatmul.mubr.msk.bf16.vlgmr.msra.gmra.mxu1 %vm229_vm2, %v918_v28  ;;  %v555_v33 = vsel %vm233_vm1, %v550_v31, 0 }
  0xa5   : > { %999 = vmatprep.mubr.msk.bf16.mxu1 %vm1198_vm0, %v1197_v0 }
  0xa6   : > { %v603_v34 = vpop.permute.xlu1 %602  ;;  %v601_v35 = vpop.permute.xlu0 %600 }
  0xa7   : > { %v605_v36 = vsel %vm604_vm9, %v601_v35, %v603_v34 }
  0xa8   : > { %v610_v37 = vsel %vm233_vm1, %v605_v36, 0  ;;  %982 = vmatmul.mubr.msk.bf16.vlgmr.msra.gmra.mxu0 %vm229_vm2, %v916_v32 }
  0xa9   : > { %998 = vmatpush3.bf16.msra.mxu1 %v610_v37  ;;  %992 = vmatpush3.bf16.msra.mxu0 %v555_v33 }
  0xaa   : > { %1009 = vmatprep.subr.bf16.mxu1 %v1197_v0  ;;  %993 = vmatprep.mubr.msk.bf16.mxu0 %vm1198_vm0, %v1197_v0  ;;  %v658_v39 = vpop.permute.xlu1 %657  ;;  %v656_v40 = vpop.permute.xlu0 %655 }
  0xab   : > { %v660_v41 = vsel %vm659_vm10, %v656_v40, %v658_v39  ;;  %1003 = vmatprep.subr.bf16.mxu0 %v1197_v0 }
  0xac   : > { %1000 = vmatmul.mubr.msk.bf16.vlgmr.msra.gmra.mxu1 %vm229_vm2, %v922_v38  ;;  %v665_v43 = vsel %vm233_vm1, %v660_v41, 0 }
  0xad   : > { %1010 = vmatpush3.bf16.msra.mxu1 %v445_v23  ;;  %1011 = vmatprep.mubr.msk.bf16.mxu1 %vm1198_vm0, %v1197_v0 }
  0xb0   : > { %994 = vmatmul.mubr.msk.bf16.vlgmr.msra.gmra.mxu0 %vm229_vm2, %v920_v42 }
  0xb1   : > { %1004 = vmatpush3.bf16.msra.mxu0 %v665_v43  ;;  %1005 = vmatprep.mubr.msk.bf16.mxu0 %vm1198_vm0, %v1197_v0 }
  0xb2   : > { %1015 = vmatprep.subr.bf16.mxu0 %v1197_v0 }
  0xb4   : > { %1012 = vmatmul.mubr.msk.bf16.vlgmr.msra.gmra.mxu1 %vm229_vm2, %v710_v49 }
  0xb8   : > { %1006 = vmatmul.mubr.msk.bf16.vlgmr.msra.gmra.mxu0 %vm229_vm2, %v924_v44 }
  0xb9   : > { %1017 = vmatprep.mubr.msk.bf16.mxu0 %vm1198_vm0, %v1197_v0 }
  0xe1   : > { %v317_v45 = vpop.f32.mrf.mxu1 }
  0xe3   : > { %v965_v46 = vpop.f32.mrf.mxu1 }
  0xe5   : > { %v320_v47 = vpop.f32.mrf.mxu1 }
  0xe7   : > { %v966_v48 = vpop.f32.mrf.mxu1 }
 0x158   : > { %v271_v50 = vpop.f32.mrf.mxu0 }
 0x159   : > { %v318_v62 = vadd.f32 %v317_v45, %v271_v50 }
 0x15a   : > { %v959_v51 = vpop.f32.mrf.mxu0 }
 0x15c   : > { %v274_v52 = vpop.f32.mrf.mxu0  ;;  %v426_v53 = vpop.f32.mrf.mxu1 }
 0x15e   : > { %v960_v54 = vpop.f32.mrf.mxu0  ;;  %v977_v55 = vpop.f32.mrf.mxu1 }
 0x160   : > { %v371_v56 = vpop.f32.mrf.mxu0  ;;  %v429_v57 = vpop.f32.mrf.mxu1 }
 0x161   : > { %v377_v1 = vadd.f32 %v371_v56, %v318_v62 }
 0x162   : > { %v971_v58 = vpop.f32.mrf.mxu0  ;;  %v978_v59 = vpop.f32.mrf.mxu1 }
 0x163   : > { %v432_v6 = vadd.f32 %v426_v53, %v377_v1 }
 0x164   : > { %v374_v60 = vpop.f32.mrf.mxu0  ;;  %v536_v61 = vpop.f32.mrf.mxu1 }
 0x166   : > { %v972_v63 = vpop.f32.mrf.mxu0  ;;  %v989_v0 = vpop.f32.mrf.mxu1 }
 0x168   : > { %v481_v2 = vpop.f32.mrf.mxu0  ;;  %v539_v3 = vpop.f32.mrf.mxu1 }
 0x169   : > { %v487_v9 = vadd.f32 %v481_v2, %v432_v6 }
 0x16a   : > { %v983_v4 = vpop.f32.mrf.mxu0  ;;  %v990_v5 = vpop.f32.mrf.mxu1 }
 0x16b   : > { %v542_v14 = vadd.f32 %v536_v61, %v487_v9 }
 0x16c   : > { %v484_v7 = vpop.f32.mrf.mxu0  ;;  %v646_v8 = vpop.f32.mrf.mxu1 }
 0x16e   : > { %v984_v10 = vpop.f32.mrf.mxu0  ;;  %v1001_v11 = vpop.f32.mrf.mxu1 }
 0x170   : > { %v591_v12 = vpop.f32.mrf.mxu0  ;;  %v649_v13 = vpop.f32.mrf.mxu1 }
 0x171   : > { %v597_v17 = vadd.f32 %v591_v12, %v542_v14 }
 0x172   : > { %v995_v15 = vpop.f32.mrf.mxu0  ;;  %v1002_v16 = vpop.f32.mrf.mxu1 }
 0x173   : > { %v652_v20 = vadd.f32 %v646_v8, %v597_v17 }
 0x174   : > { %v594_v18 = vpop.f32.mrf.mxu0  ;;  %v748_v30 = vpop.f32.mrf.mxu1 }
 0x176   : > { %v996_v19 = vpop.f32.mrf.mxu0  ;;  %v1013_v31 = vpop.f32.mrf.mxu1 }
 0x178   : > { %v701_v21 = vpop.f32.mrf.mxu0  ;;  %v751_v32 = vpop.f32.mrf.mxu1 }
 0x179   : > { %v707_v22 = vadd.f32 %v701_v21, %v652_v20 }
 0x17a   : > { %v1007_v23 = vpop.f32.mrf.mxu0  ;;  %v1014_v33 = vpop.f32.mrf.mxu1 }
 0x17b   : > { %v708_v24 = vmax.f32 %v707_v22, 0.0 }
 0x17c   : > { %v704_v25 = vpop.f32.mrf.mxu0 }
 0x17d   : > { %v709_v26 = vpack.c.bf16 %v708_v24, %v708_v24 }
 0x17e   : > { %v1008_v27 = vpop.f32.mrf.mxu0 }
 0x17f   : > { %v761_v28 = vsel %vm759_vm11, %v709_v26, 0 }
 0x180   : > { %1016 = vmatpush3.bf16.msra.mxu0 %v761_v28 }
 0x183   : > { %1018 = vmatmul.mubr.msk.bf16.vlgmr.msra.gmra.mxu0 %vm755_vm12, %v754_v29 }
 0x243   : > { %v797_v34 = vpop.f32.mrf.mxu0 }
 0x244   : > { %v798_v35 = vadd.f32 %v797_v34, %v748_v30 }
 0x245   : > { %v1019_v36 = vpop.f32.mrf.mxu0 }
 0x246   : > { %v803_v37 = vmax.f32 %v798_v35, 0.0 }
 0x247   : > { %v800_v38 = vpop.f32.mrf.mxu0 }
 0x248   : > { %804 = vst [vmem:[%s204_s11] sm:$0xff] %v803_v37 }
 0x249   : > { %v1020_v39 = vpop.f32.mrf.mxu0 }
 0x24a   : > { %1116 = shalt.err (!%p1113_p6)
}
 0x24b   : > { %s1117_s6 = scalar_lea.hbm %s1401_s23, 128  ;;  %s1121_s9 = scalar_lea.hbm %s1457_s4, 768 }
 0x24c   : > { %p1118_p7 = scmp.ne.s32.totalorder %s1401_s23, %s1117_s6  ;;  %p1122_p11 = scmp.lt.s32.totalorder %s1401_s23, %s1457_s4 }
 0x24d   : > { %p1123_p12 = scmp.lt.s32.totalorder %s1121_s9, %s1117_s6 }
 0x24e   : > { %p1119_p9 = pnand %p1118_p7, %p1284_p3 }
 0x24f   : > { %p1124_p13 = por %p1123_p12, %p1122_p11 }
 0x250   : > { %p1120_p10 = pneg %p1119_p9 }
 0x252   : > { %p1125_p0 = pnand %p1124_p13, %p1120_p10 }
 0x254   : > { %1128 = shalt.err (!%p1125_p0)
}
 0x255   : > { %1022 = dma.vmem_to_hbm [thread:$0]  (%p1284_p3), %s1403_s12, 128, %s1401_s23, %s806_s18  }
 0x256 PF: > { %p1028_p1 = scmp.ge.s32.totalorder %s1195_s22, 2  ;;  %s833_s13 = sand.u32 1, %s1167_s15  }
 0x257   : > { %s834_s14 = scalar_lea.sflag [#allocation3], %s833_s13 }
 0x258   : > { %p1025_p2 = pnand %p1028_p1, %p1293_p8 }
 0x25a   : > { %p1026_p4 = pneg %p1025_p2 }
 0x25c   : > { %1162 = dma.done.wait (%p1026_p4), %s834_s14, 128  }
 0x25d   : > { %1164 = vsyncadd (%p1026_p4), %s834_s14, 4294967168  ;;  %s17_s22 = sadd.s32 1, %s1195_s22   ;;  %s1460_s15 = smov %s1171_s16 }
 0x25e   : > { %p14_p5 = scmp.ge.s32.totalorder %s17_s22, 8   ;;  %s1461_s16 = smov %s1175_s17 }
 0x25f   : > { %s1462_s17 = smov %s1302_s7  ;;  %s1463_s18 = smov %s1187_s20 }
 0x260   : > { %s1464_s19 = smov %s1191_s21  ;;  %s1465_s20 = smov %s1468_s25 }
 0x261   : > { %s1466_s21 = smov %s1472_s26  ;;  %16 = sbr.rel (!%p14_p5) target bundleno = 5 (0x5), region = 81 }
 0x266   :  { %839 = vsyncpa [#allocation3], 1 }
 0x267   :  { %841 = vsyncpa [#allocation3 + $0x1], 1 }

</bundles_post_ra>
